<compile_context>
chip_gen: v5e
topology: v5e:2x2
jax: 0.10.0
libtpu: 0.0.40
codegen_flags: <defaults>
</compile_context>

<pallas_src>
import functools

import jax
import jax.numpy as jnp
from jax import lax
from jax.experimental import pallas as pl
from jax.experimental.pallas import tpu as pltpu

# Inner chunk width along the lane/batch axis: h is [30->32, 512] f32 = 16
# vregs, comfortably vreg-resident together with the input/output chunks.
_LANE_CHUNK = 512


def _round_up(x, m):
    return ((x + m - 1) // m) * m


def mlp_kernel(xt_ref, w1_ref, b1_ref, w2_ref, b2_ref, ot_ref, *, chunk):
    # Per grid step:
    #   xt_ref : [F, TB]   features on sublanes, batch on lanes
    #   w1_ref : [H, F]    (PyTorch fc1.weight layout), VMEM-resident
    #   b1_ref : [H, 1]
    #   w2_ref : [O, H]    (PyTorch fc2.weight layout), VMEM-resident
    #   b2_ref : [O, 1]
    #   ot_ref : [O, TB]   lane-dense output tile
    F = xt_ref.shape[0]
    TB = xt_ref.shape[1]
    n_chunks = TB // chunk  # TB is constructed as a multiple of chunk

    w1 = w1_ref[...]
    b1 = b1_ref[...]
    w2 = w2_ref[...]
    b2 = b2_ref[...]

    def body(c, carry):
        off = pl.multiple_of(c * chunk, chunk)
        x_c = xt_ref[:, pl.ds(off, chunk)]          # [F, chunk]

        # fc1: K=3 contraction -> 3 broadcasted VPU FMAs over the lane-dense
        # batch axis (an MXU pass would be almost entirely idle).
        h = w1[:, 0:1] * x_c[0:1, :]
        for k in range(1, F):                       # static unroll (F = 3)
            h = h + w1[:, k:k + 1] * x_c[k:k + 1, :]
        h = jnp.maximum(h + b1, 0.0)                # bias + ReLU (VPU)

        # fc2: [O, H] @ [H, chunk] on the MXU, f32 accumulation; bias
        # broadcast over lanes.  (HBM-bound kernel -> MXU cost is hidden.)
        y = jnp.dot(w2, h, preferred_element_type=jnp.float32) + b2

        # Sigmoid (EUP) + lane-dense store of this chunk.
        ot_ref[:, pl.ds(off, chunk)] = jax.nn.sigmoid(y).astype(ot_ref.dtype)
        return carry

    lax.fori_loop(0, n_chunks, body, 0, unroll=True)


def mlp_forward_tb(xt, w1, b1, w2, b2, *, block_b=16384):
    """MyModel forward in the kernel-native layout.

    xt : [3, B] float32  (features x batch)      -> returns [2, B] float32
    w1 : [30, 3], b1: [30], w2: [2, 30], b2: [2]  (PyTorch nn.Linear layout)

    No wrapper-side transposes; only the trailing partial batch tile is
    zero-padded (and sliced off again).
    """
    F, B = xt.shape
    H = w1.shape[0]
    O = w2.shape[0]

    # Batch tile: multiple of 128 lanes and of the inner chunk, large enough
    # to amortize per-grid-step overhead, capped at ~ceil(B/2) so large
    # batches keep >= 2 grid steps (v7x megacore sharding), and well inside
    # v7x's 64 MiB VMEM (per-step blocks are ~1 MiB double-buffered).
    # On v6e/v5e (128 MiB VMEM) block_b can be pushed to 32K-64K if residual
    # per-step overhead is still visible in profiles.
    block_b = _round_up(max(block_b, 128), _LANE_CHUNK)
    TB = min(block_b, max(_round_up(pl.cdiv(B, 2), 128), 128))
    chunk = min(_LANE_CHUNK, TB)
    TB = _round_up(TB, chunk)
    Bp = _round_up(B, TB)

    if Bp != B:
        xt_p = jnp.zeros((F, Bp), jnp.float32).at[:, :B].set(xt)
    else:
        xt_p = xt.astype(jnp.float32)

    b1c = b1.reshape(H, 1).astype(jnp.float32)
    b2c = b2.reshape(O, 1).astype(jnp.float32)

    out_t = pl.pallas_call(
        functools.partial(mlp_kernel, chunk=chunk),
        out_shape=jax.ShapeDtypeStruct((O, Bp), jnp.float32),
        grid_spec=pltpu.PrefetchScalarGridSpec(
            num_scalar_prefetch=0,
            grid=(Bp // TB,),
            in_specs=[
                pl.BlockSpec((F, TB), lambda i: (0, i)),   # x tile (batch-blocked)
                pl.BlockSpec((H, F), lambda i: (0, 0)),    # w1: resident
                pl.BlockSpec((H, 1), lambda i: (0, 0)),    # b1: resident
                pl.BlockSpec((O, H), lambda i: (0, 0)),    # w2: resident
                pl.BlockSpec((O, 1), lambda i: (0, 0)),    # b2: resident
            ],
            out_specs=pl.BlockSpec((O, TB), lambda i: (0, i)),
        ),
        compiler_params=pltpu.CompilerParams(
            dimension_semantics=("parallel",),              # megacore-shard batch
            vmem_limit_bytes=48 * 1024 * 1024,              # explicit, v7x-safe
        ),
    )(xt_p, w1.astype(jnp.float32), b1c, w2.astype(jnp.float32), b2c)

    if Bp != B:
        out_t = out_t[:, :B]
    return out_t


def mlp_forward(x, w1, b1, w2, b2, *, block_b=16384):
    """PyTorch-layout convenience wrapper: x [B, 3] -> [B, 2].

    Prefer mlp_forward_tb ([3, B] -> [2, B]) in a real pipeline so the layout
    transposes fuse into the producer/consumer instead of adding extra HBM
    passes around this memory-bound op.
    """
    return mlp_forward_tb(x.T, w1, b1, w2, b2, block_b=block_b).T


def init_params(key):
    # PyTorch nn.Linear init: U(-1/sqrt(fan_in), 1/sqrt(fan_in)), weight [out, in].
    k1, k2, k3, k4 = jax.random.split(key, 4)
    bound1 = 1.0 / jnp.sqrt(3.0)
    bound2 = 1.0 / jnp.sqrt(30.0)
    w1 = jax.random.uniform(k1, (30, 3), jnp.float32, -bound1, bound1)
    b1 = jax.random.uniform(k2, (30,), jnp.float32, -bound1, bound1)
    w2 = jax.random.uniform(k3, (2, 30), jnp.float32, -bound2, bound2)
    b2 = jax.random.uniform(k4, (2,), jnp.float32, -bound2, bound2)
    return w1, b1, w2, b2


if __name__ == "__main__":
    key = jax.random.PRNGKey(0)
    k_x, k_p = jax.random.split(key)

    B = 8  # small demo batch; the kernel is designed for, and scales to, large B
    x = jax.random.normal(k_x, (B, 3), jnp.float32)
    w1, b1, w2, b2 = init_params(k_p)

    # Kernel-native layout path ([3, B] in -> [2, B] out): no wrapper transposes.
    out_tb = jax.block_until_ready(mlp_forward_tb(x.T, w1, b1, w2, b2))

    # PyTorch-layout convenience path ([B, 3] -> [B, 2]).
    out = jax.block_until_ready(mlp_forward(x, w1, b1, w2, b2))

    # Pure-JAX reference (PyTorch semantics: x @ W.T + b).
    ref = jax.nn.sigmoid(jnp.maximum(x @ w1.T + b1, 0.0) @ w2.T + b2)
    assert out.shape == (B, 2)
    assert out_tb.shape == (2, B)
    assert jnp.allclose(out, ref, atol=1e-5), "mismatch vs reference (torch layout)"
    assert jnp.allclose(out_tb.T, ref, atol=1e-5), "mismatch vs reference (native layout)"

    print("KERNEL_OK")
</pallas_src>

<mosaic_0001>
module attributes {stable_mosaic.version = 11 : i64} {
  func.func @mlp_kernel(%arg0: i32, %arg1: memref<3x128xf32, #tpu.memory_space<vmem>>, %arg2: memref<30x3xf32, #tpu.memory_space<vmem>>, %arg3: memref<30x1xf32, #tpu.memory_space<vmem>>, %arg4: memref<2x30xf32, #tpu.memory_space<vmem>>, %arg5: memref<2x1xf32, #tpu.memory_space<vmem>>, %arg6: memref<2x128xf32, #tpu.memory_space<vmem>>) attributes {dimension_semantics = [#tpu.dimension_semantics<parallel>], iteration_bounds = array<i64: 1>, scalar_prefetch = 0 : i64, scratch_operands = 0 : i64, tpu.core_type = #tpu.core_type<tc>, window_params = [{transform_indices = @transform_0, window_bounds = array<i64: 3, 128>}, {pipeline_mode = #tpu.pipeline_mode<synchronous>, transform_indices = @transform_1, window_bounds = array<i64: 30, 3>}, {pipeline_mode = #tpu.pipeline_mode<synchronous>, transform_indices = @transform_2, window_bounds = array<i64: 30, 1>}, {pipeline_mode = #tpu.pipeline_mode<synchronous>, transform_indices = @transform_3, window_bounds = array<i64: 2, 30>}, {pipeline_mode = #tpu.pipeline_mode<synchronous>, transform_indices = @transform_4, window_bounds = array<i64: 2, 1>}, {transform_indices = @transform_5, window_bounds = array<i64: 2, 128>}]} {
    %c0 = arith.constant 0 : index
    %c0_0 = arith.constant 0 : index
    %0 = vector.load %arg2[%c0, %c0_0] : memref<30x3xf32, #tpu.memory_space<vmem>>, vector<30x3xf32>
    %c0_1 = arith.constant 0 : index
    %c0_2 = arith.constant 0 : index
    %1 = vector.load %arg3[%c0_1, %c0_2] : memref<30x1xf32, #tpu.memory_space<vmem>>, vector<30x1xf32>
    %c0_3 = arith.constant 0 : index
    %c0_4 = arith.constant 0 : index
    %2 = vector.load %arg4[%c0_3, %c0_4] : memref<2x30xf32, #tpu.memory_space<vmem>>, vector<2x30xf32>
    %c0_5 = arith.constant 0 : index
    %c0_6 = arith.constant 0 : index
    %3 = vector.load %arg5[%c0_5, %c0_6] : memref<2x1xf32, #tpu.memory_space<vmem>>, vector<2x1xf32>
    %c0_i32 = arith.constant 0 : i32
    %c128_i32 = arith.constant 128 : i32
    %4 = arith.muli %c0_i32, %c128_i32 : i32
    %5 = tpu.assume_multiple %4, 128 : i32
    %c0_7 = arith.constant 0 : index
    %6 = arith.index_cast %5 : i32 to index
    %7 = vector.load %arg1[%c0_7, %6] : memref<3x128xf32, #tpu.memory_space<vmem>>, vector<3x128xf32>
    %8 = vector.extract_strided_slice %0 {offsets = [0, 0], sizes = [30, 1], strides = [1, 1]} : vector<30x3xf32> to vector<30x1xf32>
    %9 = vector.extract_strided_slice %7 {offsets = [0, 0], sizes = [1, 128], strides = [1, 1]} : vector<3x128xf32> to vector<1x128xf32>
    %10 = vector.broadcast %8 : vector<30x1xf32> to vector<30x128xf32>
    %11 = vector.broadcast %9 : vector<1x128xf32> to vector<30x128xf32>
    %12 = arith.mulf %10, %11 : vector<30x128xf32>
    %13 = vector.extract_strided_slice %0 {offsets = [0, 1], sizes = [30, 1], strides = [1, 1]} : vector<30x3xf32> to vector<30x1xf32>
    %14 = vector.extract_strided_slice %7 {offsets = [1, 0], sizes = [1, 128], strides = [1, 1]} : vector<3x128xf32> to vector<1x128xf32>
    %15 = vector.broadcast %13 : vector<30x1xf32> to vector<30x128xf32>
    %16 = vector.broadcast %14 : vector<1x128xf32> to vector<30x128xf32>
    %17 = arith.mulf %15, %16 : vector<30x128xf32>
    %18 = arith.addf %12, %17 : vector<30x128xf32>
    %19 = vector.extract_strided_slice %0 {offsets = [0, 2], sizes = [30, 1], strides = [1, 1]} : vector<30x3xf32> to vector<30x1xf32>
    %20 = vector.extract_strided_slice %7 {offsets = [2, 0], sizes = [1, 128], strides = [1, 1]} : vector<3x128xf32> to vector<1x128xf32>
    %21 = vector.broadcast %19 : vector<30x1xf32> to vector<30x128xf32>
    %22 = vector.broadcast %20 : vector<1x128xf32> to vector<30x128xf32>
    %23 = arith.mulf %21, %22 : vector<30x128xf32>
    %24 = arith.addf %18, %23 : vector<30x128xf32>
    %25 = vector.broadcast %1 : vector<30x1xf32> to vector<30x128xf32>
    %26 = arith.addf %24, %25 : vector<30x128xf32>
    %cst = arith.constant 0.000000e+00 : f32
    %27 = vector.broadcast %cst : f32 to vector<30x128xf32>
    %28 = arith.maximumf %26, %27 : vector<30x128xf32>
    %cst_8 = arith.constant dense<0.000000e+00> : vector<2x128xf32>
    %29 = tpu.matmul %2, %28, %cst_8 {dimension_numbers = #tpu.dot_dimension_numbers<[1], [0], [0], [1], [0, 0, 1, 1], [], []>} : vector<2x30xf32>, vector<30x128xf32>, vector<2x128xf32> -> vector<2x128xf32>
    %30 = vector.broadcast %3 : vector<2x1xf32> to vector<2x128xf32>
    %31 = arith.addf %29, %30 : vector<2x128xf32>
    %32 = arith.negf %31 : vector<2x128xf32>
    %33 = math.exp %32 : vector<2x128xf32>
    %cst_9 = arith.constant 1.000000e+00 : f32
    %34 = vector.broadcast %cst_9 : f32 to vector<2x128xf32>
    %35 = arith.addf %34, %33 : vector<2x128xf32>
    %36 = arith.divf %34, %35 : vector<2x128xf32>
    %c0_10 = arith.constant 0 : index
    %37 = arith.index_cast %5 : i32 to index
    %38 = vector.load %arg6[%c0_10, %37] : memref<2x128xf32, #tpu.memory_space<vmem>>, vector<2x128xf32>
    tpu.vector_store %arg6[%c0_10, %37], %36 {strides = array<i32>} : memref<2x128xf32, #tpu.memory_space<vmem>>, vector<2x128xf32>,
    %c1_i32 = arith.constant 1 : i32
    return
  }
  func.func @transform_0(%arg0: i32) -> (i32, i32) {
    %c0_i32 = arith.constant 0 : i32
    %c0_i32_0 = arith.constant 0 : i32
    return %c0_i32, %arg0 : i32, i32
  }
  func.func @transform_1(%arg0: i32) -> (i32, i32) {
    %c0_i32 = arith.constant 0 : i32
    %c0_i32_0 = arith.constant 0 : i32
    %c0_i32_1 = arith.constant 0 : i32
    return %c0_i32, %c0_i32_0 : i32, i32
  }
  func.func @transform_2(%arg0: i32) -> (i32, i32) {
    %c0_i32 = arith.constant 0 : i32
    %c0_i32_0 = arith.constant 0 : i32
    %c0_i32_1 = arith.constant 0 : i32
    return %c0_i32, %c0_i32_0 : i32, i32
  }
  func.func @transform_3(%arg0: i32) -> (i32, i32) {
    %c0_i32 = arith.constant 0 : i32
    %c0_i32_0 = arith.constant 0 : i32
    %c0_i32_1 = arith.constant 0 : i32
    return %c0_i32, %c0_i32_0 : i32, i32
  }
  func.func @transform_4(%arg0: i32) -> (i32, i32) {
    %c0_i32 = arith.constant 0 : i32
    %c0_i32_0 = arith.constant 0 : i32
    %c0_i32_1 = arith.constant 0 : i32
    return %c0_i32, %c0_i32_0 : i32, i32
  }
  func.func @transform_5(%arg0: i32) -> (i32, i32) {
    %c0_i32 = arith.constant 0 : i32
    %c0_i32_0 = arith.constant 0 : i32
    return %c0_i32, %arg0 : i32, i32
  }
}

</mosaic_0001>

<bundles_post_ra>
// kernel: tpu_custom_call.1
= control target key start
LH: loop header
LB: loop body
LE: loop exit
PB: predicated region body
PF: predicated region fallthrough
CT: control target
= control target key end

     0   :  { %v250_v2 = vmov 1   ;;  %v251_v3 = vmov 0   ;;  %s320_s0 = inlined_call_operand.vmem [shape: f32[3,128], index: 0, kind: input, shape index: {}]   ;;  %s321_s1 = inlined_call_operand.vmem [shape: f32[30,3], index: 1, kind: input, shape index: {}]   ;;  %s322_s2 = inlined_call_operand.vmem [shape: f32[30,1], index: 2, kind: input, shape index: {}]   ;;  %s323_s3 = inlined_call_operand.vmem [shape: f32[2,30], index: 3, kind: input, shape index: {}]   ;;  %s324_s4 = inlined_call_operand.vmem [shape: f32[2,1], index: 4, kind: input, shape index: {}]   ;;  %s325_s5 = inlined_call_operand.hbm [shape: f32[2,128], index: 5, kind: output, shape index: {}]  }
   0x1   :  { %v24_v0 = vld [vmem:[%s321_s1 + $0x18] sm:$0x3f]  ;;  %v23_v1 = vld [vmem:[%s321_s1 + $0x10] sm:$0xff]  ;;  %211 = vset.pattern.permute.xlu0 %v250_v2  ;;  %213 = vset.pattern.permute.xlu1 %v251_v3 }
   0x2   :  { %70 = vperm.xlu0 %211, %v24_v0   ;;  %44 = vperm.xlu1 %213, %v23_v1  }
   0x3   :  { %10 = vsyncpa [#allocation3], 0  ;;  %v252_v4 = vmov 2   ;;  %v22_v5 = vld [vmem:[%s321_s1 + $0x8] sm:$0xff]  ;;  %v21_v6 = vld [vmem:[%s321_s1] sm:$0xff]  ;;  %vm144_vm0 = vcmask 1045504  }
   0x4   :  { %215 = vset.pattern.permute.xlu2 %v252_v4  ;;  %v27_v7 = vld [vmem:[%s322_s2 + $0x10] sm:$0xff]  ;;  %v30_v8 = vld [vmem:[%s324_s4] sm:$0x3]  ;;  %v28_v9 = vld [vmem:[%s322_s2 + $0x18] sm:$0x3f]  ;;  %vm140_vm1 = vcmask 244736  }
   0x5   :  { %95 = vperm.xlu2 %215, %v24_v0   ;;  %v26_v10 = vld [vmem:[%s322_s2 + $0x8] sm:$0xff]  ;;  %v25_v11 = vld [vmem:[%s322_s2] sm:$0xff]  ;;  %s253_s11 = smov [#allocation2]   ;;  %s195_s14 = sshll.u32 %s325_s5, 4  ;;  %s196_s14 = int_to_ptr.hbm [resolvable:$true] %s195_s14 }
   0x6   :  { %v31_v20 = vld [vmem:[%s320_s0] sm:$0x7] }
   0x7   :  { %v73_v21 = vperm.slane %v31_v20, 1  ;;  %v52_v24 = vperm.slane %v31_v20, 0  ;;  %v98_v29 = vperm.slane %v31_v20, 2  ;;  %v29_v60 = vld [vmem:[%s323_s3] sm:$0x3]  ;;  %s193_s3 = sshll.u32 %s253_s11, 4  ;;  %s194_s3 = int_to_ptr.vmem [resolvable:$true] %s193_s3 }
   0xa   :  { %212 = vset.pattern.permute.xlu0 %v251_v3  ;;  %214 = vset.pattern.permute.xlu1 %v250_v2 }
   0xb   :  { %49 = vperm.xlu0 %212, %v24_v0   ;;  %66 = vperm.xlu1 %214, %v23_v1  }
   0xd   :  { %216 = vset.pattern.permute.xlu2 %v251_v3 }
   0xe   :  { %39 = vperm.xlu2 %216, %v22_v5  }
  0x13   :  { %62 = vperm.xlu1 %214, %v22_v5   ;;  %34 = vperm.xlu0 %212, %v21_v6  }
  0x16   :  { %217 = vset.pattern.permute.xlu2 %v252_v4 }
  0x17   :  { %91 = vperm.xlu2 %217, %v23_v1  }
  0x1b   :  { %58 = vperm.xlu1 %214, %v21_v6   ;;  %119 = vperm.xlu0 %212, %v27_v7  }
  0x1f   :  { %87 = vperm.xlu2 %217, %v22_v5  }
  0x23   :  { %218 = vset.pattern.permute.xlu1 %v251_v3  ;;  %137 = vperm.xlu0 %212, %v30_v8  }
  0x24   :  { %124 = vperm.xlu1 %218, %v28_v9  }
  0x27   :  { %83 = vperm.xlu2 %217, %v21_v6  }
  0x2c   :  { %114 = vperm.xlu1 %218, %v26_v10  }
  0x2f   :  { %219 = vset.pattern.permute.xlu2 %v251_v3 }
  0x30   :  { %109 = vperm.xlu2 %219, %v25_v11  }
  0x5f   :  { %v96_v12 = vpop.permute.xlu2 %95 }
  0x60   :  { %v102_v34 = vmul.f32 %v98_v29, %v96_v12 }
  0x68   :  { %v40_v14 = vpop.permute.xlu2 %39 }
  0x69   :  { %v54_v43 = vmul.f32 %v52_v24, %v40_v14 }
  0x71   :  { %v92_v17 = vpop.permute.xlu2 %91 }
  0x72   :  { %v101_v31 = vmul.f32 %v98_v29, %v92_v17 }
  0x74   :  { %v45_v13 = vpop.permute.xlu1 %44  ;;  %v71_v15 = vpop.permute.xlu0 %70 }
  0x75   :  { %v77_v25 = vmul.f32 %v73_v21, %v71_v15  ;;  %v55_v30 = vmul.f32 %v52_v24, %v45_v13 }
  0x79   :  { %v88_v22 = vpop.permute.xlu2 %87 }
  0x7a   :  { %v100_v47 = vmul.f32 %v98_v29, %v88_v22 }
  0x7d   :  { %v67_v16 = vpop.permute.xlu1 %66  ;;  %v50_v18 = vpop.permute.xlu0 %49 }
  0x7e   :  { %v56_v26 = vmul.f32 %v52_v24, %v50_v18  ;;  %v76_v27 = vmul.f32 %v73_v21, %v67_v16 }
  0x80   :  { %v81_v32 = vadd.f32 %v77_v25, %v56_v26  ;;  %v80_v33 = vadd.f32 %v76_v27, %v55_v30 }
  0x81   :  { %v84_v37 = vpop.permute.xlu2 %83 }
  0x82   :  { %v105_v40 = vadd.f32 %v101_v31, %v80_v33  ;;  %v106_v41 = vadd.f32 %v102_v34, %v81_v32  ;;  %v99_v49 = vmul.f32 %v98_v29, %v84_v37 }
  0x85   :  { %v63_v19 = vpop.permute.xlu1 %62  ;;  %v35_v23 = vpop.permute.xlu0 %34 }
  0x86   :  { %v53_v35 = vmul.f32 %v52_v24, %v35_v23  ;;  %v75_v39 = vmul.f32 %v73_v21, %v63_v19 }
  0x88   :  { %v79_v48 = vadd.f32 %v75_v39, %v54_v43 }
  0x8a   :  { %v110_v53 = vpop.permute.xlu2 %109  ;;  %v104_v54 = vadd.f32 %v100_v47, %v79_v48 }
  0x8d   :  { %v59_v28 = vpop.permute.xlu1 %58  ;;  %v120_v38 = vpop.permute.xlu0 %119 }
  0x8e   :  { %v74_v36 = vmul.f32 %v73_v21, %v59_v28  ;;  %v129_v45 = vadd.f32 %v120_v38, %v105_v40 }
  0x90   :  { %v78_v44 = vadd.f32 %v74_v36, %v53_v35  ;;  %v133_v51 = vmax.f32 %v129_v45, 0.0 }
  0x92   :  { %v103_v52 = vadd.f32 %v99_v49, %v78_v44 }
  0x94   :  { %v127_v56 = vadd.f32 %v110_v53, %v103_v52 }
  0x95   :  { %v138_v61 = vpop.permute.xlu0 %137 }
  0x96   :  { %v125_v42 = vpop.permute.xlu1 %124  ;;  %v131_v59 = vmax.f32 %v127_v56, 0.0 }
  0x97   :  { %v130_v46 = vadd.f32 %v125_v42, %v106_v41 }
  0x99   :  { %v134_v50 = vmax.f32 %v130_v46, 0.0 }
  0x9b   :  { %204 = vmatpush.msk.msra.mxu0 %vm144_vm0, %v134_v50 }
  0x9d   :  { %161 = vmatpush.msra.mxu0 %v133_v51 }
  0x9e   :  { %v115_v55 = vpop.permute.xlu1 %114 }
  0x9f   :  { %v128_v57 = vadd.f32 %v115_v55, %v104_v54 }
  0xa1   :  { %v132_v58 = vmax.f32 %v128_v57, 0.0 }
  0xa3   :  { %162 = vmatpush.msra.mxu0 %v132_v58 }
  0xa5   :  { %163 = vmatpush.msra.mxu0 %v131_v59 }
  0xa6   :  { %205 = vmatmul.msk.f32.vlgmr.msra.gmra.mxu0 %vm140_vm1, %v29_v60 }
 0x123   :  { %v165_v62 = vpop.f32.mrf.mxu0 }
 0x124   :  { %v166_v63 = vadd.f32 %v165_v62, %v138_v61 }
 0x126   :  { %v206_v0 = vmul.f32 -1.442695, %v166_v63 }
 0x128   :  { %220 = vpow2.f32 %v206_v0 }
 0x12e   :  { %v221_v1 = vpop.eup %220 }
 0x12f   :  { %v171_v2 = vadd.f32 1.0, %v221_v1 }
 0x131   :  { %222 = vrcp.f32 %v171_v2  ;;  %v183_v6 = vand.u32 2147483648, %v171_v2  ;;  %v181_v8 = vand.u32 2147483647, %v171_v2  ;;  %vm177_vm3 = vweird.f32 %v171_v2 }
 0x133   :  { %v184_v10 = vor.u32 1.1754944e-38, %v183_v6  ;;  %vm182_vm5 = vcmp.eq.f32.partialorder %v181_v8, 8.507059e+37 }
 0x137   :  { %v223_v3 = vpop.eup %222 }
 0x138   :  { %v173_v4 = vmul.f32 %v223_v3, %v171_v2  ;;  %vm178_vm2 = vweird.f32 %v223_v3 }
 0x139   :  { %vm179_vm4 = vmor %vm177_vm3, %vm178_vm2 }
 0x13a   :  { %v174_v5 = vsub.f32 1.0, %v173_v4 }
 0x13c   :  { %v175_v7 = vmul.f32 %v223_v3, %v174_v5 }
 0x13e   :  { %v176_v9 = vadd.f32 %v223_v3, %v175_v7 }
 0x140   :  { %v180_v11 = vsel %vm179_vm4, %v223_v3, %v176_v9 }
 0x141   :  { %v185_v12 = vsel %vm182_vm5, %v184_v10, %v180_v11 }
 0x142   :  { %187 = vst [vmem:[#allocation2] sm:$0x3] %v185_v12 }
 0x143   :  { %198 = dma.vmem_to_hbm [thread:$0]  %s194_s3, 32, %s196_s14, [#allocation3]  }
 0x144   :  { %248 = dma.done.wait [#allocation3], 32  }
 0x145   :  { %249 = vsyncadd [#allocation3], 4294967264 }
 0x146   :  { %203 = vsyncpa [#allocation3], 1 }

</bundles_post_ra>
